<compile_context>
chip_gen: v5e
topology: v5e:2x2
jax: 0.10.0
libtpu: 0.0.40
codegen_flags: <defaults>
</compile_context>

<pallas_src>
import jax
import jax.numpy as jnp
from jax import lax
from jax.experimental import pallas as pl
from jax.experimental.pallas import tpu as pltpu

EPS = 1e-10        # low_bound fill value
UP_BOUND = 20.0    # up_bound fill value (w)
TINY = 1e-38       # log-domain clamp: exactly-saturated weights would give -inf

_DN = (((1,), (0,)), ((), ()))   # contract x's last dim with W's first: x @ W


def _round_up(n: int, m: int) -> int:
    return ((n + m - 1) // m) * m


def inalu_kernel(x_ref, wa_ref, wm_ref, lnm_ref, lz_ref, omg_ref, out_ref):
    x = x_ref[...]                                             # (TB, IN_P) f32
    out_p = out_ref.shape[-1]

    # Additive path, gate already folded into the weights: ga = x @ (g * W_a^T).
    ga = lax.dot_general(x, wa_ref[...], _DN,
                         preferred_element_type=jnp.float32)   # (TB, OUT_P)

    # Multiplicative (log-space) magnitude.
    x_log = jnp.log(jnp.maximum(jnp.abs(x), EPS))              # (TB, IN_P)
    nac = lax.dot_general(x_log, wm_ref[...], _DN,
                          preferred_element_type=jnp.float32)  # (TB, OUT_P)

    # Sign-product path on the MXU (no 3-D intermediate, no cross-lane prod).
    #   lnm = [ log|1-2|W_m||  |  neg_mask ]   (IN_P, 2*OUT_P), fused table.
    ind_neg = (x < 0.0).astype(jnp.float32)                    # (TB, IN_P)
    ind_zero = (x == 0.0).astype(jnp.float32)                  # (TB, IN_P)
    nm = lax.dot_general(ind_neg, lnm_ref[...], _DN,
                         preferred_element_type=jnp.float32)   # (TB, 2*OUT_P)
    log_mag = nm[:, :out_p] + lax.dot_general(
        ind_zero, lz_ref[...], _DN, preferred_element_type=jnp.float32)
    neg_count = nm[:, out_p:]                                  # exact small ints
    parity = neg_count - 2.0 * jnp.floor(neg_count * 0.5)
    sign = 1.0 - 2.0 * parity

    # Fused epilogue: one exp.  Clamp nac BEFORE adding log_mag (<= 0).
    expo = jnp.minimum(nac, UP_BOUND) + log_mag
    out_ref[...] = ga + omg_ref[...] * (sign * jnp.exp(expo))


def inalu_forward(x, W_hat_a, M_hat_a, W_hat_m, M_hat_m, G, *, tile_b=512):
    B, in_dim = x.shape
    out_dim = W_hat_a.shape[0]
    f32 = jnp.float32

    # Lane-dense padding: in to multiples of 128; out to 256 when large
    # (v6e/v7x MXU is 256 wide), else 128; batch to the batch tile.
    in_p = _round_up(in_dim, 128)
    out_p = _round_up(out_dim, 256) if out_dim > 128 else _round_up(out_dim, 128)

    b_r = _round_up(B, 8)
    tb = max(8, min(_round_up(tile_b, 8), b_r))
    if b_r // tb < 2 and b_r >= 16:
        # Guarantee >= 2 grid steps so "parallel" can use both TCs on v7x.
        tb = _round_up(-(-b_r // 2), 8)
    b_p = _round_up(b_r, tb)
    grid = (b_p // tb,)

    x_p = jnp.zeros((b_p, in_p), f32).at[:B, :in_dim].set(x.astype(f32))

    def pad_w(w):
        return jnp.zeros((out_p, in_p), f32).at[:out_dim, :in_dim].set(
            w.astype(f32))

    # One-time parameter transforms, hoisted out of the kernel (plain XLA).
    # Zero padding survives the transform: tanh(0)*sigmoid(0) == 0, so padded
    # factor-table entries become log(1) == 0 / mask 0 / weight 0.
    W_a = jnp.tanh(pad_w(W_hat_a)) * jax.nn.sigmoid(pad_w(M_hat_a))
    W_m = jnp.tanh(pad_w(W_hat_m)) * jax.nn.sigmoid(pad_w(M_hat_m))
    W_m_abs = jnp.abs(W_m)
    one_m_2w = 1.0 - 2.0 * W_m_abs

    g = jax.nn.sigmoid(G.astype(f32))
    g_p = jnp.zeros((out_p,), f32).at[:out_dim].set(g)
    omg_p = jnp.zeros((out_p,), f32).at[:out_dim].set(1.0 - g)  # padded outs -> 0

    # Pre-transpose everything to (in_p, out_p) so the kernel does plain x @ W.
    wa_g_t = (W_a * g_p[:, None]).T                    # gate folded into W_a
    wm_t = W_m.T
    lneg_t = jnp.log(jnp.maximum(jnp.abs(one_m_2w), TINY)).T
    lzero_t = jnp.log(jnp.maximum(1.0 - W_m_abs, TINY)).T
    nmask_t = (one_m_2w < 0.0).astype(f32).T
    lnm_t = jnp.concatenate([lneg_t, nmask_t], axis=1)  # (in_p, 2*out_p) fused
    omg2d = omg_p.reshape(1, out_p)

    x_spec = pl.BlockSpec((tb, in_p), lambda i: (i, 0))
    w_spec = pl.BlockSpec((in_p, out_p), lambda i: (0, 0))        # resident
    lnm_spec = pl.BlockSpec((in_p, 2 * out_p), lambda i: (0, 0))  # resident
    omg_spec = pl.BlockSpec((1, out_p), lambda i: (0, 0))         # resident
    out_spec = pl.BlockSpec((tb, out_p), lambda i: (i, 0))

    cost = pl.CostEstimate(
        flops=2 * b_p * in_p * out_p * 5 + 10 * b_p * out_p + 4 * b_p * in_p,
        transcendentals=b_p * in_p + b_p * out_p,
        bytes_accessed=4 * (b_p * in_p + b_p * out_p + 5 * in_p * out_p + out_p),
    )

    # VMEM budget: double-buffered x/out tiles + resident weight tables.
    resident_bytes = 4 * (5 * in_p * out_p + out_p)
    tile_bytes = 4 * tb * (in_p + out_p)
    vmem_limit = int(min(100 << 20,
                         max(32 << 20, 2 * (resident_bytes + tile_bytes)
                             + (4 << 20))))

    out_padded = pl.pallas_call(
        inalu_kernel,
        out_shape=jax.ShapeDtypeStruct((b_p, out_p), f32),
        grid=grid,
        in_specs=[x_spec, w_spec, w_spec, lnm_spec, w_spec, omg_spec],
        out_specs=out_spec,
        compiler_params=pltpu.CompilerParams(
            dimension_semantics=("parallel",),
            vmem_limit_bytes=vmem_limit),
        cost_estimate=cost,
    )(x_p, wa_g_t, wm_t, lnm_t, lzero_t, omg2d)

    return out_padded[:B, :out_dim]


def inalu_reference(x, W_hat_a, M_hat_a, W_hat_m, M_hat_m, G):
    """Pure-JAX reference mirroring the PyTorch forward exactly (f32)."""
    W_a = jnp.tanh(W_hat_a) * jax.nn.sigmoid(M_hat_a)
    W_m = jnp.tanh(W_hat_m) * jax.nn.sigmoid(M_hat_m)
    a = x @ W_a.T
    x_log = jnp.log(jnp.maximum(jnp.abs(x), EPS))
    nac_res = jnp.minimum(x_log @ W_m.T, UP_BOUND)
    m = jnp.exp(nac_res)
    W_m_abs = jnp.abs(W_m)
    x_sign = jnp.sign(x)[:, None, :]
    msm = x_sign * W_m_abs + 1.0 - W_m_abs
    msv = jnp.prod(msm, axis=-1)
    g = jax.nn.sigmoid(G)
    return g * a + (1.0 - g) * m * msv


if __name__ == "__main__":
    in_dim, out_dim, batch = 32, 16, 8

    key = jax.random.PRNGKey(0)
    kx, kg, k1, k2, k3, k4 = jax.random.split(key, 6)

    # Deterministic parameter init (kaiming_uniform-style bound = sqrt(6/fan_in)).
    bound = (6.0 / in_dim) ** 0.5
    W_hat_a = jax.random.uniform(k1, (out_dim, in_dim), jnp.float32, -bound, bound)
    M_hat_a = jax.random.uniform(k2, (out_dim, in_dim), jnp.float32, -bound, bound)
    W_hat_m = jax.random.uniform(k3, (out_dim, in_dim), jnp.float32, -bound, bound)
    M_hat_m = jax.random.uniform(k4, (out_dim, in_dim), jnp.float32, -bound, bound)
    G = jax.random.uniform(kg, (out_dim,), jnp.float32)          # torch.rand

    # Input with mixed signs so the sign-product path is exercised.
    x = jax.random.normal(kx, (batch, in_dim), jnp.float32)

    fwd = jax.jit(inalu_forward)
    out = jax.block_until_ready(fwd(x, W_hat_a, M_hat_a, W_hat_m, M_hat_m, G))

    ref = inalu_reference(x, W_hat_a, M_hat_a, W_hat_m, M_hat_m, G)
    assert out.shape == (batch, out_dim)
    # Slightly looser rtol: msv/(1-g)*m is computed as exp(sum of logs), the
    # gate is folded into the additive weights, and the matmul contraction
    # order differs from the reference — all f32-accurate.
    assert jnp.allclose(out, ref, rtol=1e-3, atol=1e-4), (
        f"mismatch vs reference: max abs diff {jnp.max(jnp.abs(out - ref)):.3e}")

    print("KERNEL_OK")
</pallas_src>

<mosaic_0001>
module attributes {stable_mosaic.version = 11 : i64} {
  func.func @inalu_kernel(%arg0: i32, %arg1: memref<8x128xf32, #tpu.memory_space<vmem>>, %arg2: memref<128x128xf32, #tpu.memory_space<vmem>>, %arg3: memref<128x128xf32, #tpu.memory_space<vmem>>, %arg4: memref<128x256xf32, #tpu.memory_space<vmem>>, %arg5: memref<128x128xf32, #tpu.memory_space<vmem>>, %arg6: memref<1x128xf32, #tpu.memory_space<vmem>>, %arg7: memref<8x128xf32, #tpu.memory_space<vmem>>) attributes {dimension_semantics = [#tpu.dimension_semantics<parallel>], iteration_bounds = array<i64: 1>, scalar_prefetch = 0 : i64, scratch_operands = 0 : i64, tpu.core_type = #tpu.core_type<tc>, window_params = [{transform_indices = @transform_0, window_bounds = array<i64: 8, 128>}, {pipeline_mode = #tpu.pipeline_mode<synchronous>, transform_indices = @transform_1, window_bounds = array<i64: 128, 128>}, {pipeline_mode = #tpu.pipeline_mode<synchronous>, transform_indices = @transform_2, window_bounds = array<i64: 128, 128>}, {pipeline_mode = #tpu.pipeline_mode<synchronous>, transform_indices = @transform_3, window_bounds = array<i64: 128, 256>}, {pipeline_mode = #tpu.pipeline_mode<synchronous>, transform_indices = @transform_4, window_bounds = array<i64: 128, 128>}, {pipeline_mode = #tpu.pipeline_mode<synchronous>, transform_indices = @transform_5, window_bounds = array<i64: 1, 128>}, {transform_indices = @transform_6, window_bounds = array<i64: 8, 128>}]} {
    %c0 = arith.constant 0 : index
    %c0_0 = arith.constant 0 : index
    %0 = vector.load %arg1[%c0, %c0_0] : memref<8x128xf32, #tpu.memory_space<vmem>>, vector<8x128xf32>
    %c0_1 = arith.constant 0 : index
    %c0_2 = arith.constant 0 : index
    %1 = vector.load %arg2[%c0_1, %c0_2] : memref<128x128xf32, #tpu.memory_space<vmem>>, vector<128x128xf32>
    %cst = arith.constant dense<0.000000e+00> : vector<8x128xf32>
    %2 = tpu.matmul %0, %1, %cst {dimension_numbers = #tpu.dot_dimension_numbers<[1], [0], [0], [1], [0, 0, 1, 1], [], []>} : vector<8x128xf32>, vector<128x128xf32>, vector<8x128xf32> -> vector<8x128xf32>
    %3 = math.absf %0 : vector<8x128xf32>
    %cst_3 = arith.constant 1.000000e-10 : f32
    %4 = vector.broadcast %cst_3 : f32 to vector<8x128xf32>
    %5 = arith.maximumf %3, %4 : vector<8x128xf32>
    %6 = math.log %5 : vector<8x128xf32>
    %c0_4 = arith.constant 0 : index
    %c0_5 = arith.constant 0 : index
    %7 = vector.load %arg3[%c0_4, %c0_5] : memref<128x128xf32, #tpu.memory_space<vmem>>, vector<128x128xf32>
    %cst_6 = arith.constant dense<0.000000e+00> : vector<8x128xf32>
    %8 = tpu.matmul %6, %7, %cst_6 {dimension_numbers = #tpu.dot_dimension_numbers<[1], [0], [0], [1], [0, 0, 1, 1], [], []>} : vector<8x128xf32>, vector<128x128xf32>, vector<8x128xf32> -> vector<8x128xf32>
    %cst_7 = arith.constant 0.000000e+00 : f32
    %9 = vector.broadcast %cst_7 : f32 to vector<8x128xf32>
    %10 = arith.cmpf olt, %0, %9 : vector<8x128xf32>
    %11 = arith.extui %10 : vector<8x128xi1> to vector<8x128xi32>
    %12 = arith.sitofp %11 : vector<8x128xi32> to vector<8x128xf32>
    %cst_8 = arith.constant 0.000000e+00 : f32
    %13 = vector.broadcast %cst_8 : f32 to vector<8x128xf32>
    %14 = arith.cmpf oeq, %0, %13 : vector<8x128xf32>
    %15 = arith.extui %14 : vector<8x128xi1> to vector<8x128xi32>
    %16 = arith.sitofp %15 : vector<8x128xi32> to vector<8x128xf32>
    %c0_9 = arith.constant 0 : index
    %c0_10 = arith.constant 0 : index
    %17 = vector.load %arg4[%c0_9, %c0_10] : memref<128x256xf32, #tpu.memory_space<vmem>>, vector<128x256xf32>
    %cst_11 = arith.constant dense<0.000000e+00> : vector<8x256xf32>
    %18 = tpu.matmul %12, %17, %cst_11 {dimension_numbers = #tpu.dot_dimension_numbers<[1], [0], [0], [1], [0, 0, 1, 1], [], []>} : vector<8x128xf32>, vector<128x256xf32>, vector<8x256xf32> -> vector<8x256xf32>
    %19 = vector.extract_strided_slice %18 {offsets = [0, 0], sizes = [8, 128], strides = [1, 1]} : vector<8x256xf32> to vector<8x128xf32>
    %c0_12 = arith.constant 0 : index
    %c0_13 = arith.constant 0 : index
    %20 = vector.load %arg5[%c0_12, %c0_13] : memref<128x128xf32, #tpu.memory_space<vmem>>, vector<128x128xf32>
    %cst_14 = arith.constant dense<0.000000e+00> : vector<8x128xf32>
    %21 = tpu.matmul %16, %20, %cst_14 {dimension_numbers = #tpu.dot_dimension_numbers<[1], [0], [0], [1], [0, 0, 1, 1], [], []>} : vector<8x128xf32>, vector<128x128xf32>, vector<8x128xf32> -> vector<8x128xf32>
    %22 = arith.addf %19, %21 : vector<8x128xf32>
    %23 = vector.extract_strided_slice %18 {offsets = [0, 128], sizes = [8, 128], strides = [1, 1]} : vector<8x256xf32> to vector<8x128xf32>
    %cst_15 = arith.constant 5.000000e-01 : f32
    %24 = vector.broadcast %cst_15 : f32 to vector<8x128xf32>
    %25 = arith.mulf %23, %24 : vector<8x128xf32>
    %26 = math.floor %25 : vector<8x128xf32>
    %cst_16 = arith.constant 2.000000e+00 : f32
    %27 = vector.broadcast %cst_16 : f32 to vector<8x128xf32>
    %28 = arith.mulf %27, %26 : vector<8x128xf32>
    %29 = arith.subf %23, %28 : vector<8x128xf32>
    %cst_17 = arith.constant 2.000000e+00 : f32
    %30 = vector.broadcast %cst_17 : f32 to vector<8x128xf32>
    %31 = arith.mulf %30, %29 : vector<8x128xf32>
    %cst_18 = arith.constant 1.000000e+00 : f32
    %32 = vector.broadcast %cst_18 : f32 to vector<8x128xf32>
    %33 = arith.subf %32, %31 : vector<8x128xf32>
    %cst_19 = arith.constant 2.000000e+01 : f32
    %34 = vector.broadcast %cst_19 : f32 to vector<8x128xf32>
    %35 = arith.minimumf %8, %34 : vector<8x128xf32>
    %36 = arith.addf %35, %22 : vector<8x128xf32>
    %c0_20 = arith.constant 0 : index
    %c0_21 = arith.constant 0 : index
    %37 = vector.load %arg6[%c0_20, %c0_21] : memref<1x128xf32, #tpu.memory_space<vmem>>, vector<1x128xf32>
    %38 = math.exp %36 : vector<8x128xf32>
    %39 = arith.mulf %33, %38 : vector<8x128xf32>
    %40 = vector.broadcast %37 : vector<1x128xf32> to vector<8x128xf32>
    %41 = arith.mulf %40, %39 : vector<8x128xf32>
    %42 = arith.addf %2, %41 : vector<8x128xf32>
    %c0_22 = arith.constant 0 : index
    %c0_23 = arith.constant 0 : index
    %43 = vector.load %arg7[%c0_22, %c0_23] : memref<8x128xf32, #tpu.memory_space<vmem>>, vector<8x128xf32>
    tpu.vector_store %arg7[%c0_22, %c0_23], %42 {strides = array<i32>} : memref<8x128xf32, #tpu.memory_space<vmem>>, vector<8x128xf32>,
    return
  }
  func.func @transform_0(%arg0: i32) -> (i32, i32) {
    %c0_i32 = arith.constant 0 : i32
    %c0_i32_0 = arith.constant 0 : i32
    return %arg0, %c0_i32 : i32, i32
  }
  func.func @transform_1(%arg0: i32) -> (i32, i32) {
    %c0_i32 = arith.constant 0 : i32
    %c0_i32_0 = arith.constant 0 : i32
    %c0_i32_1 = arith.constant 0 : i32
    return %c0_i32, %c0_i32_0 : i32, i32
  }
  func.func @transform_2(%arg0: i32) -> (i32, i32) {
    %c0_i32 = arith.constant 0 : i32
    %c0_i32_0 = arith.constant 0 : i32
    %c0_i32_1 = arith.constant 0 : i32
    return %c0_i32, %c0_i32_0 : i32, i32
  }
  func.func @transform_3(%arg0: i32) -> (i32, i32) {
    %c0_i32 = arith.constant 0 : i32
    %c0_i32_0 = arith.constant 0 : i32
    %c0_i32_1 = arith.constant 0 : i32
    return %c0_i32, %c0_i32_0 : i32, i32
  }
  func.func @transform_4(%arg0: i32) -> (i32, i32) {
    %c0_i32 = arith.constant 0 : i32
    %c0_i32_0 = arith.constant 0 : i32
    %c0_i32_1 = arith.constant 0 : i32
    return %c0_i32, %c0_i32_0 : i32, i32
  }
  func.func @transform_5(%arg0: i32) -> (i32, i32) {
    %c0_i32 = arith.constant 0 : i32
    %c0_i32_0 = arith.constant 0 : i32
    %c0_i32_1 = arith.constant 0 : i32
    return %c0_i32, %c0_i32_0 : i32, i32
  }
  func.func @transform_6(%arg0: i32) -> (i32, i32) {
    %c0_i32 = arith.constant 0 : i32
    %c0_i32_0 = arith.constant 0 : i32
    return %arg0, %c0_i32 : i32, i32
  }
}

</mosaic_0001>

<bundles_post_ra>
// kernel: inalu_forward.1
= control target key start
LH: loop header
LB: loop body
LE: loop exit
PB: predicated region body
PF: predicated region fallthrough
CT: control target
= control target key end

     0   :  { %s583_s0 = inlined_call_operand.vmem [shape: f32[8,128], index: 0, kind: input, shape index: {}]   ;;  %s584_s1 = inlined_call_operand.vmem [shape: f32[128,128], index: 1, kind: input, shape index: {}]   ;;  %s585_s2 = inlined_call_operand.vmem [shape: f32[128,128], index: 2, kind: input, shape index: {}]   ;;  %s586_s3 = inlined_call_operand.vmem [shape: f32[128,256], index: 3, kind: input, shape index: {}]   ;;  %s587_s4 = inlined_call_operand.vmem [shape: f32[128,128], index: 4, kind: input, shape index: {}]   ;;  %s588_s5 = inlined_call_operand.vmem [shape: f32[1,128], index: 5, kind: input, shape index: {}]   ;;  %s589_s6 = inlined_call_operand.hbm [shape: f32[8,128], index: 6, kind: output, shape index: {}]  }
   0x1   :  { %v60_v0 = vld [vmem:[%s585_s2 + $0x78] sm:$0xff]  ;;  %v59_v1 = vld [vmem:[%s585_s2 + $0x70] sm:$0xff]  ;;  %v58_v5 = vld [vmem:[%s585_s2 + $0x68] sm:$0xff] }
   0x2   :  { %v174_v2 = vld [vmem:[%s587_s4 + $0x78] sm:$0xff]  ;;  %61 = vmatpush.msra.mxu0 %v60_v0  ;;  %v173_v4 = vld [vmem:[%s587_s4 + $0x70] sm:$0xff]  ;;  %v116_v6 = vld [vmem:[%s586_s3 + $0xe8] sm:$0xff] }
   0x3   :  { %175 = vmatpush.msra.mxu3 %v174_v2  ;;  %v118_v3 = vld [vmem:[%s586_s3 + $0xf8] sm:$0xff]  ;;  %v172_v7 = vld [vmem:[%s587_s4 + $0x68] sm:$0xff]  ;;  %v117_v9 = vld [vmem:[%s586_s3 + $0xf0] sm:$0xff] }
   0x4   :  { %139 = vmatpush.msra.mxu2 %v118_v3  ;;  %62 = vmatpush.msra.mxu0 %v59_v1  ;;  %v114_v8 = vld [vmem:[%s586_s3 + $0xd8] sm:$0xff]  ;;  %v57_v10 = vld [vmem:[%s585_s2 + $0x60] sm:$0xff]  ;;  %v112_v12 = vld [vmem:[%s586_s3 + $0xc8] sm:$0xff] }
   0x5   :  { %176 = vmatpush.msra.mxu3 %v173_v4  ;;  %119 = vmatpush.msra.mxu1 %v117_v9  ;;  %v171_v11 = vld [vmem:[%s587_s4 + $0x60] sm:$0xff]  ;;  %v56_v14 = vld [vmem:[%s585_s2 + $0x58] sm:$0xff]  ;;  %v113_v16 = vld [vmem:[%s586_s3 + $0xd0] sm:$0xff] }
   0x6   :  { %140 = vmatpush.msra.mxu2 %v116_v6  ;;  %63 = vmatpush.msra.mxu0 %v58_v5  ;;  %v115_v13 = vld [vmem:[%s586_s3 + $0xe0] sm:$0xff]  ;;  %v170_v15 = vld [vmem:[%s587_s4 + $0x58] sm:$0xff]  ;;  %v55_v19 = vld [vmem:[%s585_s2 + $0x50] sm:$0xff] }
   0x7   :  { %177 = vmatpush.msra.mxu3 %v172_v7  ;;  %120 = vmatpush.msra.mxu1 %v115_v13  ;;  %v110_v17 = vld [vmem:[%s586_s3 + $0xb8] sm:$0xff]  ;;  %v111_v18 = vld [vmem:[%s586_s3 + $0xc0] sm:$0xff]  ;;  %v169_v20 = vld [vmem:[%s587_s4 + $0x50] sm:$0xff] }
   0x8   :  { %141 = vmatpush.msra.mxu2 %v114_v8  ;;  %64 = vmatpush.msra.mxu0 %v57_v10  ;;  %v108_v21 = vld [vmem:[%s586_s3 + $0xa8] sm:$0xff]  ;;  %v109_v22 = vld [vmem:[%s586_s3 + $0xb0] sm:$0xff]  ;;  %v106_v25 = vld [vmem:[%s586_s3 + $0x98] sm:$0xff] }
   0x9   :  { %178 = vmatpush.msra.mxu3 %v171_v11  ;;  %121 = vmatpush.msra.mxu1 %v113_v16  ;;  %v54_v23 = vld [vmem:[%s585_s2 + $0x48] sm:$0xff]  ;;  %v107_v26 = vld [vmem:[%s586_s3 + $0xa0] sm:$0xff]  ;;  %v105_v30 = vld [vmem:[%s586_s3 + $0x90] sm:$0xff] }
   0xa   :  { %142 = vmatpush.msra.mxu2 %v112_v12  ;;  %65 = vmatpush.msra.mxu0 %v56_v14  ;;  %v168_v24 = vld [vmem:[%s587_s4 + $0x48] sm:$0xff]  ;;  %v53_v27 = vld [vmem:[%s585_s2 + $0x40] sm:$0xff]  ;;  %v52_v31 = vld [vmem:[%s585_s2 + $0x38] sm:$0xff] }
   0xb   :  { %179 = vmatpush.msra.mxu3 %v170_v15  ;;  %122 = vmatpush.msra.mxu1 %v111_v18  ;;  %v167_v28 = vld [vmem:[%s587_s4 + $0x40] sm:$0xff]  ;;  %v104_v29 = vld [vmem:[%s586_s3 + $0x88] sm:$0xff]  ;;  %v166_v32 = vld [vmem:[%s587_s4 + $0x38] sm:$0xff] }
   0xc   :  { %143 = vmatpush.msra.mxu2 %v110_v17  ;;  %66 = vmatpush.msra.mxu0 %v55_v19  ;;  %v102_v33 = vld [vmem:[%s586_s3 + $0x78] sm:$0xff]  ;;  %v103_v34 = vld [vmem:[%s586_s3 + $0x80] sm:$0xff]  ;;  %v51_v35 = vld [vmem:[%s585_s2 + $0x30] sm:$0xff] }
   0xd   :  { %180 = vmatpush.msra.mxu3 %v169_v20  ;;  %123 = vmatpush.msra.mxu1 %v109_v22  ;;  %v165_v36 = vld [vmem:[%s587_s4 + $0x30] sm:$0xff]  ;;  %v100_v37 = vld [vmem:[%s586_s3 + $0x68] sm:$0xff]  ;;  %v98_v41 = vld [vmem:[%s586_s3 + $0x58] sm:$0xff] }
   0xe   :  { %144 = vmatpush.msra.mxu2 %v108_v21  ;;  %67 = vmatpush.msra.mxu0 %v54_v23  ;;  %v101_v38 = vld [vmem:[%s586_s3 + $0x70] sm:$0xff]  ;;  %v50_v39 = vld [vmem:[%s585_s2 + $0x28] sm:$0xff]  ;;  %v99_v42 = vld [vmem:[%s586_s3 + $0x60] sm:$0xff] }
   0xf   :  { %181 = vmatpush.msra.mxu3 %v168_v24  ;;  %124 = vmatpush.msra.mxu1 %v107_v26  ;;  %v164_v40 = vld [vmem:[%s587_s4 + $0x28] sm:$0xff]  ;;  %v49_v43 = vld [vmem:[%s585_s2 + $0x20] sm:$0xff]  ;;  %v97_v47 = vld [vmem:[%s586_s3 + $0x50] sm:$0xff] }
  0x10   :  { %145 = vmatpush.msra.mxu2 %v106_v25  ;;  %68 = vmatpush.msra.mxu0 %v53_v27  ;;  %v163_v44 = vld [vmem:[%s587_s4 + $0x20] sm:$0xff]  ;;  %v96_v46 = vld [vmem:[%s586_s3 + $0x48] sm:$0xff]  ;;  %v48_v48 = vld [vmem:[%s585_s2 + $0x18] sm:$0xff] }
  0x11   :  { %182 = vmatpush.msra.mxu3 %v167_v28  ;;  %125 = vmatpush.msra.mxu1 %v105_v30  ;;  %v462_v45 = vld [vmem:[%s583_s0] sm:$0xff]  ;;  %v162_v49 = vld [vmem:[%s587_s4 + $0x18] sm:$0xff]  ;;  %v47_v53 = vld [vmem:[%s585_s2 + $0x10] sm:$0xff] }
  0x12   :  { %146 = vmatpush.msra.mxu2 %v104_v29  ;;  %69 = vmatpush.msra.mxu0 %v52_v31  ;;  %v41_v50 = vand.u32 2147483647, %v462_v45  ;;  %v94_v51 = vld [vmem:[%s586_s3 + $0x38] sm:$0xff]  ;;  %v95_v52 = vld [vmem:[%s586_s3 + $0x40] sm:$0xff]  ;;  %v161_v54 = vld [vmem:[%s587_s4 + $0x10] sm:$0xff] }
  0x13   :  { %183 = vmatpush.msra.mxu3 %v166_v32  ;;  %126 = vmatpush.msra.mxu1 %v103_v34  ;;  %v92_v56 = vld [vmem:[%s586_s3 + $0x28] sm:$0xff]  ;;  %v93_v57 = vld [vmem:[%s586_s3 + $0x30] sm:$0xff]  ;;  %v90_v60 = vld [vmem:[%s586_s3 + $0x18] sm:$0xff] }
  0x14   :  { %147 = vmatpush.msra.mxu2 %v102_v33  ;;  %70 = vmatpush.msra.mxu0 %v51_v35  ;;  %v42_v55 = vmax.f32 %v41_v50, 1e-10  ;;  %v46_v58 = vld [vmem:[%s585_s2 + $0x8] sm:$0xff]  ;;  %v91_v61 = vld [vmem:[%s586_s3 + $0x20] sm:$0xff] }
  0x15   :  { %184 = vmatpush.msra.mxu3 %v165_v36  ;;  %127 = vmatpush.msra.mxu1 %v101_v38  ;;  %v160_v59 = vld [vmem:[%s587_s4 + $0x8] sm:$0xff] }
  0x16   :  { %148 = vmatpush.msra.mxu2 %v100_v37  ;;  %71 = vmatpush.msra.mxu0 %v50_v39  ;;  %257 = vlog2.f32 %v42_v55 }
  0x17   :  { %185 = vmatpush.msra.mxu3 %v164_v40  ;;  %128 = vmatpush.msra.mxu1 %v99_v42 }
  0x18   :  { %149 = vmatpush.msra.mxu2 %v98_v41  ;;  %72 = vmatpush.msra.mxu0 %v49_v43 }
  0x19   :  { %186 = vmatpush.msra.mxu3 %v163_v44  ;;  %129 = vmatpush.msra.mxu1 %v97_v47 }
  0x1a   :  { %150 = vmatpush.msra.mxu2 %v96_v46  ;;  %73 = vmatpush.msra.mxu0 %v48_v48 }
  0x1b   :  { %187 = vmatpush.msra.mxu3 %v162_v49  ;;  %130 = vmatpush.msra.mxu1 %v95_v52 }
  0x1c   :  { %151 = vmatpush.msra.mxu2 %v94_v51  ;;  %74 = vmatpush.msra.mxu0 %v47_v53 }
  0x1d   :  { %188 = vmatpush.msra.mxu3 %v161_v54 }
  0x1e   :  { %11 = vsyncpa [#allocation3], 0  ;;  %152 = vmatpush.msra.mxu2 %v92_v56  ;;  %v45_v62 = vld [vmem:[%s585_s2] sm:$0xff]  ;;  %131 = vmatpush.msra.mxu1 %v93_v57  ;;  %v40_v0 = vld [vmem:[%s584_s1 + $0x78] sm:$0xff]  ;;  %vm84_vm0 = vcmp.eq.f32.partialorder %v462_v45, 0.0  ;;  %vm81_vm1 = vcmp.lt.f32.partialorder %v462_v45, 0.0  ;;  %v258_v4 = vpop.eup %257 }
  0x1f   :  { %v159_v63 = vld [vmem:[%s587_s4] sm:$0xff]  ;;  %75 = vmatpush.msra.mxu0 %v46_v58  ;;  %189 = vmatpush.msra.mxu3 %v160_v59  ;;  %v88_v1 = vld [vmem:[%s586_s3 + $0x8] sm:$0xff]  ;;  %v39_v2 = vld [vmem:[%s584_s1 + $0x70] sm:$0xff]  ;;  %v287_v5 = vmov 1.0   ;;  %v44_v8 = vmul.f32 0.6931472, %v258_v4 }
  0x20   :  { %153 = vmatpush.msra.mxu2 %v90_v60  ;;  %132 = vmatpush.msra.mxu1 %v91_v61  ;;  %v89_v3 = vld [vmem:[%s586_s3 + $0x10] sm:$0xff]  ;;  %v38_v6 = vld [vmem:[%s584_s1 + $0x68] sm:$0xff]  ;;  %v87_v7 = vld [vmem:[%s586_s3] sm:$0xff]  ;;  %s288_s8 = smov [#allocation2]   ;;  %s240_s12 = sshll.u32 %s589_s6, 4  ;;  %s241_s12 = int_to_ptr.hbm [resolvable:$true] %s240_s12 }
  0x21   :  { %76 = vmatpush.msra.mxu0 %v45_v62  ;;  %190 = vmatpush.msra.mxu3 %v159_v63  ;;  %v37_v9 = vld [vmem:[%s584_s1 + $0x60] sm:$0xff]  ;;  %v36_v10 = vld [vmem:[%s584_s1 + $0x58] sm:$0xff]  ;;  %v35_v11 = vld [vmem:[%s584_s1 + $0x50] sm:$0xff]  ;;  %s238_s9 = sshll.u32 %s288_s8, 4  ;;  %s239_s9 = int_to_ptr.vmem [resolvable:$true] %s238_s9 }
  0x22   :  { %154 = vmatpush.msra.mxu2 %v88_v1  ;;  %253 = vmatmul.msk.f32.vlgmr.msra.gmra.mxu3 %vm84_vm0, %v287_v5  ;;  %v34_v12 = vld [vmem:[%s584_s1 + $0x48] sm:$0xff]  ;;  %v33_v13 = vld [vmem:[%s584_s1 + $0x40] sm:$0xff]  ;;  %v32_v14 = vld [vmem:[%s584_s1 + $0x38] sm:$0xff] }
  0x23   :  { %212 = vmatpush.msrb.mxu0 %v40_v0  ;;  %252 = vmatmul.msk.f32.vlgmr.msra.gmra.mxu2 %vm81_vm1, %v287_v5  ;;  %v31_v15 = vld [vmem:[%s584_s1 + $0x30] sm:$0xff]  ;;  %v30_v16 = vld [vmem:[%s584_s1 + $0x28] sm:$0xff]  ;;  %v29_v17 = vld [vmem:[%s584_s1 + $0x20] sm:$0xff] }
  0x24   :  { %133 = vmatpush.msra.mxu1 %v89_v3  ;;  %77 = vmatmul.f32.vlgmr.msra.gmra.mxu0 %v44_v8  ;;  %v28_v18 = vld [vmem:[%s584_s1 + $0x18] sm:$0xff]  ;;  %v27_v19 = vld [vmem:[%s584_s1 + $0x10] sm:$0xff]  ;;  %v26_v20 = vld [vmem:[%s584_s1 + $0x8] sm:$0xff] }
  0x25   :  { %213 = vmatpush.msrb.mxu0 %v39_v2  ;;  %v25_v21 = vld [vmem:[%s584_s1] sm:$0xff] }
  0x26   :  { %134 = vmatpush.msra.mxu1 %v87_v7  ;;  %v256_v38 = vld [vmem:[%s588_s5] ss:$0 sm:$0xff] }
  0x27   :  { %214 = vmatpush.msrb.mxu0 %v38_v6  ;;  %251 = vmatmul.msk.f32.vlgmr.msra.gmra.mxu1 %vm81_vm1, %v287_v5 }
  0x29   :  { %215 = vmatpush.msrb.mxu0 %v37_v9 }
  0x2b   :  { %216 = vmatpush.msrb.mxu0 %v36_v10 }
  0x2d   :  { %217 = vmatpush.msrb.mxu0 %v35_v11 }
  0x2f   :  { %218 = vmatpush.msrb.mxu0 %v34_v12 }
  0x31   :  { %219 = vmatpush.msrb.mxu0 %v33_v13 }
  0x33   :  { %220 = vmatpush.msrb.mxu0 %v32_v14 }
  0x35   :  { %221 = vmatpush.msrb.mxu0 %v31_v15 }
  0x37   :  { %222 = vmatpush.msrb.mxu0 %v30_v16 }
  0x39   :  { %223 = vmatpush.msrb.mxu0 %v29_v17 }
  0x3b   :  { %224 = vmatpush.msrb.mxu0 %v28_v18 }
  0x3d   :  { %225 = vmatpush.msrb.mxu0 %v27_v19 }
  0x3f   :  { %226 = vmatpush.msrb.mxu0 %v26_v20 }
  0x41   :  { %227 = vmatpush.msrb.mxu0 %v25_v21 }
  0x42   :  { %228 = vmatmul.f32.vlgmr.msrb.gmra.mxu0 %v462_v45 }
  0xa1   :  { %v78_v22 = vpop.f32.mrf.mxu0 }
  0xa2   :  { %v202_v24 = vmin.f32 %v78_v22, 20.0 }
  0xa4   :  { %v136_v23 = vpop.f32.mrf.mxu1 }
  0xa5   :  { %v192_v25 = vpop.f32.mrf.mxu3 }
  0xa6   :  { %v156_v26 = vpop.f32.mrf.mxu2  ;;  %v195_v27 = vadd.f32 %v192_v25, %v136_v23 }
  0xa7   :  { %v196_v28 = vmul.f32 0.5, %v156_v26 }
  0xa8   :  { %v203_v29 = vadd.f32 %v202_v24, %v195_v27 }
  0xa9   :  { %v197_v30 = vfloor.f32 %v196_v28 }
  0xaa   :  { %v205_v32 = vmul.f32 1.442695, %v203_v29 }
  0xab   :  { %v198_v31 = vmul.f32 2.0, %v197_v30 }
  0xac   :  { %259 = vpow2.f32 %v205_v32 }
  0xad   :  { %v199_v33 = vsub.f32 %v156_v26, %v198_v31 }
  0xaf   :  { %v200_v34 = vmul.f32 2.0, %v199_v33 }
  0xb1   :  { %v201_v35 = vsub.f32 1.0, %v200_v34 }
  0xb2   :  { %v260_v36 = vpop.eup %259 }
  0xb3   :  { %v207_v37 = vmul.f32 %v260_v36, %v201_v35 }
  0xb5   :  { %v211_v39 = vmul.f32 %v256_v38, %v207_v37 }
  0xbf   :  { %v229_v40 = vpop.f32.mrf.mxu0 }
  0xc0   :  { %v230_v41 = vadd.f32 %v229_v40, %v211_v39 }
  0xc2   :  { %232 = vst [vmem:[#allocation2] sm:$0xff] %v230_v41 }
  0xc3   :  { %243 = dma.vmem_to_hbm [thread:$0]  %s239_s9, 128, %s241_s12, [#allocation3]  }
  0xc4   :  { %285 = dma.done.wait [#allocation3], 128  }
  0xc5   :  { %286 = vsyncadd [#allocation3], 4294967168 }
  0xc6   :  { %248 = vsyncpa [#allocation3], 1 }

</bundles_post_ra>
